<compile_context>
chip_gen: v5e
topology: v5e:2x2
jax: 0.10.0
libtpu: 0.0.40
codegen_flags: <defaults>
</compile_context>

<pallas_src>
import functools
import math

import jax
import jax.numpy as jnp
from jax.experimental import pallas as pl
from jax.experimental.pallas import tpu as pltpu


_SMALL_INPUT_BYTES = 1 << 20       # below ~1 MiB plain XLA beats a pallas_call
_LANE_CAP = 16 * 1024              # max lane-tile width (keeps (1,tl) param padding small)
_ROW_CAP_ROW_BCAST = 2048          # max row-tile when params are (tr,1) (lane-padded in VMEM)


def _ssf_kernel(x_ref, scale_ref, shift_ref, o_ref):
    # scale/shift blocks are (tr, 1) (row broadcast) or (1, tl) (lane
    # broadcast) in f32; jnp broadcasting covers both. Compute in f32, cast at
    # the store (free: kernel is memory-bound).
    x = x_ref[...].astype(jnp.float32)
    o_ref[...] = (x * scale_ref[...] + shift_ref[...]).astype(o_ref.dtype)


@functools.lru_cache(maxsize=None)
def _vmem_budget():
    """(vmem_limit_bytes, target x-block bytes), generation-aware."""
    phys = 64 * 1024 * 1024                    # conservative default (v7x = 64 MiB)
    try:
        info = pltpu.get_tpu_info()
        for name in ("vmem_capacity_bytes", "vmem_size_bytes"):
            cap = getattr(info, name, None)
            if cap:
                phys = int(cap)
                break
    except Exception:
        pass
    limit = min(phys * 3 // 4, 96 * 1024 * 1024)   # 48 MiB on v7x, 96 MiB on v5e/v6e
    block = min(16 * 1024 * 1024, limit // 8)       # 6 MiB on v7x, 12 MiB on v5e/v6e
    return limit, block


def _choose_tiles(R, L, x_item, out_item, row_broadcast, block_bytes):
    """Pick a (row, lane) tile: lane-dense, (sub,128)-aligned, ~block_bytes."""
    # dtype-dependent sublane quantum: 8 for f32, 16 for bf16, 32 for int8/fp8.
    sub = max(8, 32 // max(1, min(x_item, out_item)))
    target_elems = max(sub * 128, block_bytes // x_item)

    # Lane tile: as wide as possible (lane-dense stores), capped so the
    # sublane-padded (1, tl) param blocks stay small.
    lane_budget = min(_LANE_CAP, max(128, target_elems // sub))
    if L <= lane_budget:
        tl = L
    else:
        tl = (lane_budget // 128) * 128

    # Row tile: fill the remaining block budget.
    max_rows = max(sub, target_elems // max(tl, 1))
    if row_broadcast:
        # (tr, 1) f32 param blocks are lane-padded to tr*128*4 B in VMEM.
        max_rows = min(max_rows, _ROW_CAP_ROW_BCAST)
    if R <= max_rows:
        tr = R
    else:
        tr = (max_rows // sub) * sub

    # v7x megacore: ensure non-tiny inputs produce >= 2 grid programs so both
    # TensorCores stream (v5e/v6e unaffected).
    if pl.cdiv(R, tr) * pl.cdiv(L, tl) < 2 and R * L * x_item > (2 << 20):
        if tl >= 256 and tl % 128 == 0:
            tl = max(128, ((tl // 2 + 127) // 128) * 128)
        elif tr >= 2 * sub:
            half = tr // 2
            tr = max(sub, ((half + sub - 1) // sub) * sub)
    return tr, tl


def _ssf_2d(x2d, scale2d, shift2d, out_dtype, row_broadcast):
    """y = x2d * scale2d + shift2d with scale/shift broadcast along one axis.

    row_broadcast=True : scale2d/shift2d have shape (R, 1)
    row_broadcast=False: scale2d/shift2d have shape (1, L)
    """
    R, L = x2d.shape
    x_item = jnp.dtype(x2d.dtype).itemsize
    out_item = jnp.dtype(out_dtype).itemsize
    vmem_limit, block_bytes = _vmem_budget()
    tr, tl = _choose_tiles(R, L, x_item, out_item, row_broadcast, block_bytes)
    grid = (pl.cdiv(R, tr), pl.cdiv(L, tl))

    if row_broadcast:
        p_block = (tr, 1)
        p_map = lambda i, j: (i, 0)
    else:
        p_block = (1, tl)
        p_map = lambda i, j: (0, j)

    cost = pl.CostEstimate(
        flops=2 * R * L,
        transcendentals=0,
        bytes_accessed=R * L * (x_item + out_item) + 2 * scale2d.size * 4,
    )

    return pl.pallas_call(
        _ssf_kernel,
        out_shape=jax.ShapeDtypeStruct((R, L), out_dtype),
        grid_spec=pltpu.PrefetchScalarGridSpec(
            num_scalar_prefetch=0,
            grid=grid,
            in_specs=[
                pl.BlockSpec((tr, tl), lambda i, j: (i, j)),
                pl.BlockSpec(p_block, p_map),
                pl.BlockSpec(p_block, p_map),
            ],
            out_specs=pl.BlockSpec((tr, tl), lambda i, j: (i, j)),
        ),
        compiler_params=pltpu.CompilerParams(
            dimension_semantics=("parallel", "parallel"),
            vmem_limit_bytes=vmem_limit,
        ),
        cost_estimate=cost,
    )(x2d, scale2d, shift2d)


def _fold_factor(M, C):
    """g with (g*C) % 128 == 0 and M % g == 0 (lane-dense fold); 0 if none."""
    g = 128 // math.gcd(C, 128)       # minimal lane-dense fold (1 when C % 128 == 0)
    if M % g != 0:
        return 0
    # Widen the lane axis a bit while rows stay divisible and >= 8.
    while g * 2 * C <= 4096 and M % (g * 2) == 0 and M // (g * 2) >= 8:
        g *= 2
    return g


def _jnp_ref(x, scale32, shift32, out_dtype):
    """Plain-XLA path: tiny inputs and shapes with no lane-dense 2-D view."""
    if x.ndim == 4:
        y = (x.astype(jnp.float32) * scale32.reshape(1, -1, 1, 1)
             + shift32.reshape(1, -1, 1, 1))
    else:
        y = x.astype(jnp.float32) * scale32 + shift32
    return y.astype(out_dtype)


def ssf_forward(x, scale, shift, *, small_input_fastpath=True):
    """Matches SSF.forward from the PyTorch module."""
    out_dtype = jnp.promote_types(x.dtype, scale.dtype)
    scale32 = scale.astype(jnp.float32)
    shift32 = shift.astype(jnp.float32)
    x_item = jnp.dtype(x.dtype).itemsize

    if small_input_fastpath and x.size * x_item < _SMALL_INPUT_BYTES:
        return _jnp_ref(x, scale32, shift32, out_dtype)

    if x.ndim == 4:
        N, C, H, W = x.shape
        assert scale.shape == (C,)
        P = H * W
        if P % 128 == 0 and N * C > 1:
            # Native NCHW: rows=(n,c), lanes=H*W. Lane-dense stores, params as
            # a tiny per-row column (no extra HBM traffic).
            x2 = x.reshape(N * C, P)
            s2 = jnp.tile(scale32, N).reshape(N * C, 1)
            t2 = jnp.tile(shift32, N).reshape(N * C, 1)
            y2 = _ssf_2d(x2, s2, t2, out_dtype, row_broadcast=True)
            return y2.reshape(N, C, H, W)
        if (C * P) % 128 == 0:
            # Per-sample flatten: rows=n, lanes=C*H*W. Lane-dense even when
            # H*W is 49/196-style; params become a small repeated (1, C*H*W)
            # row read once per row-block.
            x2 = x.reshape(N, C * P)
            s2 = jnp.repeat(scale32, P).reshape(1, C * P)
            t2 = jnp.repeat(shift32, P).reshape(1, C * P)
            y2 = _ssf_2d(x2, s2, t2, out_dtype, row_broadcast=False)
            return y2.reshape(N, C, H, W)
        # No lane-dense view (C*H*W not a multiple of 128): masked stores would
        # dominate a Pallas version, so let XLA handle it.
        return _jnp_ref(x, scale32, shift32, out_dtype)
    else:
        C = x.shape[-1]
        assert scale.shape == (C,)
        lead = x.shape[:-1]
        M = 1
        for d in lead:
            M *= d
        g = _fold_factor(M, C)
        if g:
            # Lane-densify: (M, C) -> (M/g, g*C), params tiled g times.
            x2 = x.reshape(M // g, g * C)
            s2 = jnp.tile(scale32, g).reshape(1, g * C)
            t2 = jnp.tile(shift32, g).reshape(1, g * C)
            y2 = _ssf_2d(x2, s2, t2, out_dtype, row_broadcast=False)
            return y2.reshape(*lead, C)
        if C >= 128:
            # C not a multiple of 128 and rows don't fold: still >=50% lane
            # utilization, keep it in Pallas.
            x2 = x.reshape(M, C)
            s2 = scale32.reshape(1, C)
            t2 = shift32.reshape(1, C)
            y2 = _ssf_2d(x2, s2, t2, out_dtype, row_broadcast=False)
            return y2.reshape(*lead, C)
        # C < 128 and no lane-dense fold exists: fall back to XLA.
        return _jnp_ref(x, scale32, shift32, out_dtype)


if __name__ == "__main__":
    key = jax.random.PRNGKey(0)
    k_x4, k_scale, k_shift, k_x2 = jax.random.split(key, 4)

    # Parameter init mirroring nn.init.normal_ in SSF.__init__.
    in_dim = 4
    scale = 1.0 + 0.02 * jax.random.normal(k_scale, (in_dim,), dtype=jnp.float32)
    shift = 0.02 * jax.random.normal(k_shift, (in_dim,), dtype=jnp.float32)

    # 4D (NCHW) path -> row-broadcast Pallas kernel (H*W = 256 is lane-dense).
    x4 = jax.random.normal(k_x4, (2, 4, 16, 16), dtype=jnp.float32)
    y4 = jax.block_until_ready(
        ssf_forward(x4, scale, shift, small_input_fastpath=False))
    ref4 = x4 * scale.reshape(1, -1, 1, 1) + shift.reshape(1, -1, 1, 1)
    assert y4.shape == x4.shape and y4.dtype == x4.dtype
    assert jnp.allclose(y4, ref4, atol=1e-5, rtol=1e-5)

    # Generic feature-last path -> folded lane-broadcast Pallas kernel (g*C=128).
    x2 = jax.random.normal(k_x2, (8, 32, in_dim), dtype=jnp.float32)
    y2 = jax.block_until_ready(
        ssf_forward(x2, scale, shift, small_input_fastpath=False))
    ref2 = x2 * scale + shift
    assert y2.shape == x2.shape and y2.dtype == x2.dtype
    assert jnp.allclose(y2, ref2, atol=1e-5, rtol=1e-5)

    # Small-input fast path (default settings) sanity check.
    y2_fast = jax.block_until_ready(ssf_forward(x2, scale, shift))
    assert jnp.allclose(y2_fast, ref2, atol=1e-5, rtol=1e-5)

    print("KERNEL_OK")
</pallas_src>

<mosaic_0001>
module attributes {stable_mosaic.version = 11 : i64} {
  func.func @_ssf_kernel(%arg0: i32, %arg1: i32, %arg2: memref<8x256xf32, #tpu.memory_space<vmem>>, %arg3: memref<8x1xf32, #tpu.memory_space<vmem>>, %arg4: memref<8x1xf32, #tpu.memory_space<vmem>>, %arg5: memref<8x256xf32, #tpu.memory_space<vmem>>) attributes {dimension_semantics = [#tpu.dimension_semantics<parallel>, #tpu.dimension_semantics<parallel>], iteration_bounds = array<i64: 1, 1>, scalar_prefetch = 0 : i64, scratch_operands = 0 : i64, tpu.core_type = #tpu.core_type<tc>, window_params = [{transform_indices = @transform_0, window_bounds = array<i64: 8, 256>}, {transform_indices = @transform_1, window_bounds = array<i64: 8, 1>}, {transform_indices = @transform_2, window_bounds = array<i64: 8, 1>}, {transform_indices = @transform_3, window_bounds = array<i64: 8, 256>}]} {
    %c0 = arith.constant 0 : index
    %c0_0 = arith.constant 0 : index
    %0 = vector.load %arg2[%c0, %c0_0] : memref<8x256xf32, #tpu.memory_space<vmem>>, vector<8x256xf32>
    %c0_1 = arith.constant 0 : index
    %c0_2 = arith.constant 0 : index
    %1 = vector.load %arg3[%c0_1, %c0_2] : memref<8x1xf32, #tpu.memory_space<vmem>>, vector<8x1xf32>
    %2 = vector.broadcast %1 : vector<8x1xf32> to vector<8x256xf32>
    %3 = arith.mulf %0, %2 : vector<8x256xf32>
    %c0_3 = arith.constant 0 : index
    %c0_4 = arith.constant 0 : index
    %4 = vector.load %arg4[%c0_3, %c0_4] : memref<8x1xf32, #tpu.memory_space<vmem>>, vector<8x1xf32>
    %5 = vector.broadcast %4 : vector<8x1xf32> to vector<8x256xf32>
    %6 = arith.addf %3, %5 : vector<8x256xf32>
    %c0_5 = arith.constant 0 : index
    %c0_6 = arith.constant 0 : index
    %7 = vector.load %arg5[%c0_5, %c0_6] : memref<8x256xf32, #tpu.memory_space<vmem>>, vector<8x256xf32>
    tpu.vector_store %arg5[%c0_5, %c0_6], %6 {strides = array<i32>} : memref<8x256xf32, #tpu.memory_space<vmem>>, vector<8x256xf32>,
    return
  }
  func.func @transform_0(%arg0: i32, %arg1: i32) -> (i32, i32) {
    %c0_i32 = arith.constant 0 : i32
    return %arg0, %arg1 : i32, i32
  }
  func.func @transform_1(%arg0: i32, %arg1: i32) -> (i32, i32) {
    %c0_i32 = arith.constant 0 : i32
    %c0_i32_0 = arith.constant 0 : i32
    return %arg0, %c0_i32 : i32, i32
  }
  func.func @transform_2(%arg0: i32, %arg1: i32) -> (i32, i32) {
    %c0_i32 = arith.constant 0 : i32
    %c0_i32_0 = arith.constant 0 : i32
    return %arg0, %c0_i32 : i32, i32
  }
  func.func @transform_3(%arg0: i32, %arg1: i32) -> (i32, i32) {
    %c0_i32 = arith.constant 0 : i32
    return %arg0, %arg1 : i32, i32
  }
}

</mosaic_0001>

<bundles_post_ra>
// kernel: tpu_custom_call.1
= control target key start
LH: loop header
LB: loop body
LE: loop exit
PB: predicated region body
PF: predicated region fallthrough
CT: control target
= control target key end

     0   :  { %s117_s0 = inlined_call_operand.vmem [shape: f32[8,256], index: 0, kind: input, shape index: {}]   ;;  %s118_s1 = inlined_call_operand.vmem [shape: f32[8,1], index: 1, kind: input, shape index: {}]   ;;  %s119_s2 = inlined_call_operand.vmem [shape: f32[8,1], index: 2, kind: input, shape index: {}]   ;;  %s120_s3 = inlined_call_operand.hbm [shape: f32[8,256], index: 3, kind: output, shape index: {}]  }
   0x1   :  { %v17_v0 = vld [vmem:[%s118_s1] sm:$0xff] }
   0x2   :  { %8 = vsyncpa [#allocation3], 0  ;;  %v80_v1 = vmov 0   ;;  %v25_v2 = vld [vmem:[%s119_s2] sm:$0xff]  ;;  %v16_v5 = vld [vmem:[%s117_s0 + $0x8] sm:$0xff]  ;;  %s81_s1 = smov [#allocation2]  }
   0x3   :  { %53 = vset.pattern.permute.xlu0 %v80_v1  ;;  %v15_v4 = vld [vmem:[%s117_s0] sm:$0xff]  ;;  %s40_s20 = sshll.u32 %s81_s1, 4  ;;  %s42_s23 = sshll.u32 %s120_s3, 4  ;;  %s41_s20 = int_to_ptr.vmem [resolvable:$true] %s40_s20  ;;  %s43_s23 = int_to_ptr.hbm [resolvable:$true] %s42_s23 }
   0x4   :  { %20 = vperm.xlu0 %53, %v17_v0  }
   0xc   :  { %28 = vperm.xlu0 %53, %v25_v2  }
  0x76   :  { %v21_v3 = vpop.permute.xlu0 %20 }
  0x77   :  { %v23_v6 = vmul.f32 %v21_v3, %v15_v4  ;;  %v24_v7 = vmul.f32 %v21_v3, %v16_v5 }
  0x7e   :  { %v29_v8 = vpop.permute.xlu0 %28 }
  0x7f   :  { %v31_v9 = vadd.f32 %v29_v8, %v23_v6  ;;  %v32_v10 = vadd.f32 %v29_v8, %v24_v7 }
  0x81   :  { %33 = vst [vmem:[#allocation2] sm:$0xff] %v31_v9 }
  0x82   :  { %34 = vst [vmem:[#allocation2 + $0x8] sm:$0xff] %v32_v10 }
  0x83   :  { %45 = dma.vmem_to_hbm [thread:$0]  %s41_s20, 256, %s43_s23, [#allocation3]  }
  0x84   :  { %78 = dma.done.wait [#allocation3], 256  }
  0x85   :  { %79 = vsyncadd [#allocation3], 4294967040 }
  0x86   :  { %50 = vsyncpa [#allocation3], 1 }

</bundles_post_ra>
